<compile_context>
chip_gen: v6e
topology: v6e:2x2x1
jax: 0.10.0
libtpu: 0.0.40
codegen_flags: <defaults>
</compile_context>

<pallas_src>
import functools

import jax
import jax.numpy as jnp
from jax.experimental import pallas as pl
from jax.experimental.pallas import tpu as pltpu


# ----------------------------------------------------------------------------
# Fused kernel body. Grid axis 0 = graph group. Per step:
#   L SAGE layers on the group's Gb*N nodes (block-diag aggregation matmul +
#   fused concat matmul), root gather into a persistent VMEM scratch.
# Last step: classification head over all G roots (BN needs the full batch).
# ----------------------------------------------------------------------------
def _sage_fused_kernel(x_ref, a_ref, w_ref, bl_ref, w1_ref, b1_ref, gamma_ref, beta_ref,
                       w2_ref, b2_ref, out_ref, xg_ref, root_ref, *,
                       num_layers, nodes_per_graph, graphs_per_step, class_count):
    g = pl.program_id(0)

    # --- SAGE layers on this group's nodes -----------------------------------------
    x = x_ref[...]                      # [Gb*N, F]   (f32 or bf16 matmul operands)
    a = a_ref[...]                      # [Gb*N, Gb*N] block-diag, row-normalized
    cdt = x.dtype
    h = x.astype(jnp.float32)
    for l in range(num_layers):
        mp = jnp.dot(a, x, preferred_element_type=jnp.float32)            # mean aggregation
        cat = jnp.concatenate([mp.astype(cdt), x], axis=-1)               # torch.cat((mp, old), 1)
        h = jnp.dot(cat, w_ref[l], preferred_element_type=jnp.float32) + bl_ref[l]
        x = h.astype(cdt)

    # --- Root gather: strided sublane read of rows 0, N, 2N, ... (no sel matmul) ---
    xg_ref[...] = h                                                        # f32 final features
    roots = xg_ref[pl.ds(0, graphs_per_step, stride=nodes_per_graph), :]   # [Gb, F]
    start = pl.multiple_of(g * graphs_per_step, graphs_per_step)
    root_ref[pl.ds(start, graphs_per_step), :] = roots                    # persistent [G, F]

    # --- Head runs once, after every group deposited its roots ---------------------
    @pl.when(g == pl.num_programs(0) - 1)
    def _():
        r = root_ref[...]                                                  # [G, F] f32
        hh = jnp.dot(r, w1_ref[...], preferred_element_type=jnp.float32) + b1_ref[...]
        mean = jnp.mean(hh, axis=0, keepdims=True)                         # BN training stats
        var = jnp.mean((hh - mean) * (hh - mean), axis=0, keepdims=True)
        hn = (hh - mean) * jax.lax.rsqrt(var + 1e-5) * gamma_ref[...] + beta_ref[...]
        hr = jnp.maximum(hn, 0.0)
        logits = jnp.dot(hr, w2_ref[...], preferred_element_type=jnp.float32) + b2_ref[...]
        if class_count == 1:
            out_ref[...] = 1.0 / (1.0 + jnp.exp(-logits))                  # sigmoid path
        else:
            m = jnp.max(logits, axis=1, keepdims=True)                     # softmax(dim=1)
            e = jnp.exp(logits - m)
            out_ref[...] = e / jnp.sum(e, axis=1, keepdims=True)           # exact normalization


# ----------------------------------------------------------------------------
# One-time graph preprocessing: MeanAggregator row-normalization (f32) and the
# per-group block-diagonal adjacency. Do NOT redo per forward call when adjs is static.
# ----------------------------------------------------------------------------
def preprocess_graphs(feats, adjs, *, graphs_per_step, compute_dtype=jnp.float32):
    G, N, F = feats.shape
    Gb = graphs_per_step
    assert G % Gb == 0, "num graphs must be divisible by graphs_per_step (pad the batch)"
    NG = G // Gb

    deg = jnp.sum(adjs, axis=2, keepdims=True)
    adjs_n = adjs / jnp.maximum(deg, 1.0)                      # normalize in f32
    a4 = adjs_n.reshape(NG, Gb, N, N)
    eye = jnp.eye(Gb, dtype=adjs_n.dtype)
    a_bd = jnp.einsum("pq,gpij->gpiqj", eye, a4)               # per-group block-diag
    a_grp = a_bd.reshape(NG * Gb * N, Gb * N).astype(compute_dtype)   # [NG*Gb*N, Gb*N]
    x_flat = feats.reshape(G * N, F).astype(compute_dtype)            # [G*N, F]
    return x_flat, a_grp


# ----------------------------------------------------------------------------
# Forward wrapper: ONE pallas_call over graph groups.
# ----------------------------------------------------------------------------
def sage_test_forward(x_flat, a_grp, params, *, class_count, nodes_per_graph):
    GN, F = x_flat.shape
    TbN = a_grp.shape[1]                 # group tile size = Gb * N
    Gb = TbN // nodes_per_graph
    G = GN // nodes_per_graph
    NG = GN // TbN
    L = params["w_layers"].shape[0]
    C_pad = params["w2_pad"].shape[1]

    cdt = x_flat.dtype
    w_layers = params["w_layers"].astype(cdt)    # layer matmul operands match x/A dtype

    kernel = functools.partial(
        _sage_fused_kernel, num_layers=L, nodes_per_graph=nodes_per_graph,
        graphs_per_step=Gb, class_count=class_count)

    out_padded = pl.pallas_call(
        kernel,
        out_shape=jax.ShapeDtypeStruct((G, C_pad), jnp.float32),
        grid_spec=pltpu.PrefetchScalarGridSpec(
            num_scalar_prefetch=0,
            grid=(NG,),
            in_specs=[
                pl.BlockSpec((TbN, F), lambda g: (g, 0)),          # node features tile
                pl.BlockSpec((TbN, TbN), lambda g: (g, 0)),        # block-diag A tile
                pl.BlockSpec((L, 2 * F, F), lambda g: (0, 0, 0)),  # layer weights (resident)
                pl.BlockSpec((L, 1, F), lambda g: (0, 0, 0)),      # layer biases
                pl.BlockSpec((F, 64), lambda g: (0, 0)),           # lin1 weight^T
                pl.BlockSpec((1, 64), lambda g: (0, 0)),           # lin1 bias
                pl.BlockSpec((1, 64), lambda g: (0, 0)),           # BN gamma
                pl.BlockSpec((1, 64), lambda g: (0, 0)),           # BN beta
                pl.BlockSpec((64, C_pad), lambda g: (0, 0)),       # lin2 weight^T (lane-padded)
                pl.BlockSpec((1, C_pad), lambda g: (0, 0)),        # lin2 bias (lane-padded)
            ],
            out_specs=pl.BlockSpec((G, C_pad), lambda g: (0, 0)),  # resident, written at last step
            scratch_shapes=[
                pltpu.VMEM((TbN, F), jnp.float32),                 # final-layer features (group)
                pltpu.VMEM((G, F), jnp.float32),                   # accumulated root features
            ],
        ),
        compiler_params=pltpu.CompilerParams(
            # "arbitrary": root accumulation + BN finalize need sequential grid steps.
            dimension_semantics=("arbitrary",),
            # Tile-sizing rule: double-buffered (TbN,TbN) A tile costs 2*4*TbN^2 bytes in f32
            # (half in bf16); keep it well under 64 MiB on v7x / raise default scoped limits.
            vmem_limit_bytes=32 * 1024 * 1024,
        ),
    )(x_flat, a_grp, w_layers,
      params["b_layers"], params["w1_t"], params["b1"],
      params["gamma"], params["beta"], params["w2_pad"], params["b2_pad"])

    return out_padded[:, :class_count]


# ----------------------------------------------------------------------------
# Parameter init (torch nn.Linear default uniform init shapes). Layer weights are
# pre-transposed to [2F, F] so the kernel does concat([mp, old]) @ W directly; the
# lin2 weight/bias are lane-padded to 128 (padded biases = -1e9 -> zero softmax mass).
# ----------------------------------------------------------------------------
def init_params(key, F, n_layers, C):
    keys = jax.random.split(key, 2 * n_layers + 4)
    ki = 0
    w_layers, b_layers = [], []
    for _ in range(n_layers):
        bound = 1.0 / jnp.sqrt(2.0 * F)
        w = jax.random.uniform(keys[ki], (F, 2 * F), jnp.float32, -bound, bound); ki += 1
        b = jax.random.uniform(keys[ki], (F,), jnp.float32, -bound, bound); ki += 1
        w_layers.append(w.T)                      # [2F, F]; rows 0:F <-> mp, F:2F <-> old
        b_layers.append(b.reshape(1, F))

    bound1 = 1.0 / jnp.sqrt(float(F))
    w1 = jax.random.uniform(keys[ki], (64, F), jnp.float32, -bound1, bound1); ki += 1
    b1 = jax.random.uniform(keys[ki], (64,), jnp.float32, -bound1, bound1); ki += 1
    bound2 = 1.0 / jnp.sqrt(64.0)
    w2 = jax.random.uniform(keys[ki], (C, 64), jnp.float32, -bound2, bound2); ki += 1
    b2 = jax.random.uniform(keys[ki], (C,), jnp.float32, -bound2, bound2); ki += 1

    C_pad = ((C + 127) // 128) * 128              # lane-dense output slab
    w2_pad = jnp.zeros((64, C_pad), jnp.float32).at[:, :C].set(w2.T)
    pad_val = 0.0 if C == 1 else -1e9             # keep padded lanes out of the softmax sum
    b2_pad = jnp.full((1, C_pad), pad_val, jnp.float32).at[0, :C].set(b2)

    return {
        "w_layers": jnp.stack(w_layers),          # [L, 2F, F]
        "b_layers": jnp.stack(b_layers),          # [L, 1, F]
        "w1_t": w1.T,                             # [F, 64]
        "b1": b1.reshape(1, 64),
        "gamma": jnp.ones((1, 64), jnp.float32),  # BatchNorm default init
        "beta": jnp.zeros((1, 64), jnp.float32),
        "w2_pad": w2_pad,                         # [64, C_pad]
        "b2_pad": b2_pad,                         # [1, C_pad]
    }


# ----------------------------------------------------------------------------
# Pure-JAX reference (mirrors the torch module) for the correctness check.
# ----------------------------------------------------------------------------
def _reference_forward(feats, adjs, params, class_count):
    x = feats
    L = params["w_layers"].shape[0]
    deg = jnp.sum(adjs, axis=2, keepdims=True)
    for l in range(L):
        mp = jnp.einsum("gij,gjf->gif", adjs, x) / jnp.maximum(deg, 1.0)
        cat = jnp.concatenate([mp, x], axis=-1)
        x = jnp.einsum("gnk,kf->gnf", cat, params["w_layers"][l]) + params["b_layers"][l]
    root = x[:, 0, :]
    h = root @ params["w1_t"] + params["b1"]
    mean = jnp.mean(h, axis=0, keepdims=True)
    var = jnp.mean((h - mean) ** 2, axis=0, keepdims=True)
    hn = (h - mean) * jax.lax.rsqrt(var + 1e-5) * params["gamma"] + params["beta"]
    hr = jnp.maximum(hn, 0.0)
    C = class_count
    logits = hr @ params["w2_pad"][:, :C] + params["b2_pad"][:, :C]
    if class_count == 1:
        return jax.nn.sigmoid(logits)
    return jax.nn.softmax(logits, axis=1)


if __name__ == "__main__":
    G, N, F = 4, 8, 16            # graphs, nodes/graph, input_features
    LAYERS, C = 2, 3              # graph_sample_layers, class_count (>1 -> softmax path)
    GRAPHS_PER_STEP = 2           # toy value; use >=16 at N=8 in production so M,K >= 128

    key = jax.random.PRNGKey(0)
    k_feat, k_adj, k_param = jax.random.split(key, 3)

    feats = jax.random.normal(k_feat, (G, N, F), jnp.float32)
    adj_raw = (jax.random.uniform(k_adj, (G, N, N)) < 0.4).astype(jnp.float32)
    adjs = jnp.maximum(adj_raw, jnp.transpose(adj_raw, (0, 2, 1)))   # symmetric 0/1 adjacency

    params = init_params(k_param, F, LAYERS, C)

    # One-time preprocessing (adjacency normalization + per-group block-diag).
    x_flat, a_grp = preprocess_graphs(feats, adjs, graphs_per_step=GRAPHS_PER_STEP,
                                      compute_dtype=jnp.float32)

    forward = jax.jit(functools.partial(sage_test_forward, class_count=C, nodes_per_graph=N))

    # f32 path: tight correctness check vs the pure-JAX reference.
    out = jax.block_until_ready(forward(x_flat, a_grp, params))
    assert out.shape == (G, C)
    assert bool(jnp.all(jnp.isfinite(out)))
    ref = _reference_forward(feats, adjs, params, C)
    assert bool(jnp.allclose(out, ref, rtol=5e-3, atol=5e-3)), "mismatch vs reference"

    # bf16 matmul-operand path (v6e/v7x fast path: 2x MXU, half the A-tile DMA/VMEM);
    # BN/softmax math stays f32 inside the kernel, so rows still sum to exactly 1.
    x_bf, a_bf = preprocess_graphs(feats, adjs, graphs_per_step=GRAPHS_PER_STEP,
                                   compute_dtype=jnp.bfloat16)
    out_bf = jax.block_until_ready(forward(x_bf, a_bf, params))
    assert out_bf.shape == (G, C)
    assert bool(jnp.all(jnp.isfinite(out_bf)))
    assert bool(jnp.allclose(jnp.sum(out_bf, axis=1), 1.0, atol=1e-3))

    print("KERNEL_OK")
</pallas_src>

<mosaic_0001>
module attributes {stable_mosaic.version = 11 : i64} {
  func.func @_sage_fused_kernel(%arg0: i32, %arg1: memref<16x16xf32, #tpu.memory_space<vmem>>, %arg2: memref<16x16xf32, #tpu.memory_space<vmem>>, %arg3: memref<2x32x16xf32, #tpu.memory_space<vmem>>, %arg4: memref<2x1x16xf32, #tpu.memory_space<vmem>>, %arg5: memref<16x64xf32, #tpu.memory_space<vmem>>, %arg6: memref<1x64xf32, #tpu.memory_space<vmem>>, %arg7: memref<1x64xf32, #tpu.memory_space<vmem>>, %arg8: memref<1x64xf32, #tpu.memory_space<vmem>>, %arg9: memref<64x128xf32, #tpu.memory_space<vmem>>, %arg10: memref<1x128xf32, #tpu.memory_space<vmem>>, %arg11: memref<4x128xf32, #tpu.memory_space<vmem>>, %arg12: memref<16x16xf32, #tpu.memory_space<vmem>>, %arg13: memref<4x16xf32, #tpu.memory_space<vmem>>) attributes {dimension_semantics = [#tpu.dimension_semantics<arbitrary>], iteration_bounds = array<i64: 2>, scalar_prefetch = 0 : i64, scratch_operands = 2 : i64, tpu.core_type = #tpu.core_type<tc>, window_params = [{transform_indices = @transform_0, window_bounds = array<i64: 16, 16>}, {transform_indices = @transform_1, window_bounds = array<i64: 16, 16>}, {pipeline_mode = #tpu.pipeline_mode<synchronous>, transform_indices = @transform_2, window_bounds = array<i64: 2, 32, 16>}, {pipeline_mode = #tpu.pipeline_mode<synchronous>, transform_indices = @transform_3, window_bounds = array<i64: 2, 1, 16>}, {pipeline_mode = #tpu.pipeline_mode<synchronous>, transform_indices = @transform_4, window_bounds = array<i64: 16, 64>}, {pipeline_mode = #tpu.pipeline_mode<synchronous>, transform_indices = @transform_5, window_bounds = array<i64: 1, 64>}, {pipeline_mode = #tpu.pipeline_mode<synchronous>, transform_indices = @transform_6, window_bounds = array<i64: 1, 64>}, {pipeline_mode = #tpu.pipeline_mode<synchronous>, transform_indices = @transform_7, window_bounds = array<i64: 1, 64>}, {pipeline_mode = #tpu.pipeline_mode<synchronous>, transform_indices = @transform_8, window_bounds = array<i64: 64, 128>}, {pipeline_mode = #tpu.pipeline_mode<synchronous>, transform_indices = @transform_9, window_bounds = array<i64: 1, 128>}, {pipeline_mode = #tpu.pipeline_mode<synchronous>, transform_indices = @transform_10, window_bounds = array<i64: 4, 128>}]} {
    %c0 = arith.constant 0 : index
    %c0_0 = arith.constant 0 : index
    %0 = vector.load %arg1[%c0, %c0_0] : memref<16x16xf32, #tpu.memory_space<vmem>>, vector<16x16xf32>
    %c0_1 = arith.constant 0 : index
    %c0_2 = arith.constant 0 : index
    %1 = vector.load %arg2[%c0_1, %c0_2] : memref<16x16xf32, #tpu.memory_space<vmem>>, vector<16x16xf32>
    %cst = arith.constant dense<0.000000e+00> : vector<16x16xf32>
    %2 = tpu.matmul %1, %0, %cst {dimension_numbers = #tpu.dot_dimension_numbers<[1], [0], [0], [1], [0, 0, 1, 1], [], []>} : vector<16x16xf32>, vector<16x16xf32>, vector<16x16xf32> -> vector<16x16xf32>
    %3 = tpu.concatenate %2, %0 in 1 : vector<16x16xf32>, vector<16x16xf32> -> vector<16x32xf32>
    %c0_3 = arith.constant 0 : index
    %c0_4 = arith.constant 0 : index
    %c0_5 = arith.constant 0 : index
    %4 = vector.load %arg3[%c0_3, %c0_4, %c0_5] : memref<2x32x16xf32, #tpu.memory_space<vmem>>, vector<1x32x16xf32>
    %5 = vector.shape_cast %4 : vector<1x32x16xf32> to vector<32x16xf32>
    %cst_6 = arith.constant dense<0.000000e+00> : vector<16x16xf32>
    %6 = tpu.matmul %3, %5, %cst_6 {dimension_numbers = #tpu.dot_dimension_numbers<[1], [0], [0], [1], [0, 0, 1, 1], [], []>} : vector<16x32xf32>, vector<32x16xf32>, vector<16x16xf32> -> vector<16x16xf32>
    %c0_7 = arith.constant 0 : index
    %c0_8 = arith.constant 0 : index
    %c0_9 = arith.constant 0 : index
    %7 = vector.load %arg4[%c0_7, %c0_8, %c0_9] : memref<2x1x16xf32, #tpu.memory_space<vmem>>, vector<1x1x16xf32>
    %8 = vector.shape_cast %7 : vector<1x1x16xf32> to vector<1x16xf32>
    %9 = vector.broadcast %8 : vector<1x16xf32> to vector<16x16xf32>
    %10 = arith.addf %6, %9 : vector<16x16xf32>
    %cst_10 = arith.constant dense<0.000000e+00> : vector<16x16xf32>
    %11 = tpu.matmul %1, %10, %cst_10 {dimension_numbers = #tpu.dot_dimension_numbers<[1], [0], [0], [1], [0, 0, 1, 1], [], []>} : vector<16x16xf32>, vector<16x16xf32>, vector<16x16xf32> -> vector<16x16xf32>
    %12 = tpu.concatenate %11, %10 in 1 : vector<16x16xf32>, vector<16x16xf32> -> vector<16x32xf32>
    %c1 = arith.constant 1 : index
    %c0_11 = arith.constant 0 : index
    %c0_12 = arith.constant 0 : index
    %13 = vector.load %arg3[%c1, %c0_11, %c0_12] : memref<2x32x16xf32, #tpu.memory_space<vmem>>, vector<1x32x16xf32>
    %14 = vector.shape_cast %13 : vector<1x32x16xf32> to vector<32x16xf32>
    %cst_13 = arith.constant dense<0.000000e+00> : vector<16x16xf32>
    %15 = tpu.matmul %12, %14, %cst_13 {dimension_numbers = #tpu.dot_dimension_numbers<[1], [0], [0], [1], [0, 0, 1, 1], [], []>} : vector<16x32xf32>, vector<32x16xf32>, vector<16x16xf32> -> vector<16x16xf32>
    %c1_14 = arith.constant 1 : index
    %c0_15 = arith.constant 0 : index
    %c0_16 = arith.constant 0 : index
    %16 = vector.load %arg4[%c1_14, %c0_15, %c0_16] : memref<2x1x16xf32, #tpu.memory_space<vmem>>, vector<1x1x16xf32>
    %17 = vector.shape_cast %16 : vector<1x1x16xf32> to vector<1x16xf32>
    %18 = vector.broadcast %17 : vector<1x16xf32> to vector<16x16xf32>
    %19 = arith.addf %15, %18 : vector<16x16xf32>
    %c0_17 = arith.constant 0 : index
    %c0_18 = arith.constant 0 : index
    %20 = vector.load %arg12[%c0_17, %c0_18] : memref<16x16xf32, #tpu.memory_space<vmem>>, vector<16x16xf32>
    tpu.vector_store %arg12[%c0_17, %c0_18], %19 {strides = array<i32>} : memref<16x16xf32, #tpu.memory_space<vmem>>, vector<16x16xf32>,
    %c0_19 = arith.constant 0 : index
    %c0_20 = arith.constant 0 : index
    %21 = tpu.strided_load %arg12[%c0_19, %c0_20] {strides = array<i32: 8, 1>} : memref<16x16xf32, #tpu.memory_space<vmem>>, vector<2x16xf32>
    %c2_i32 = arith.constant 2 : i32
    %22 = arith.muli %arg0, %c2_i32 : i32
    %23 = tpu.assume_multiple %22, 2 : i32
    %24 = arith.index_cast %23 : i32 to index
    %c0_21 = arith.constant 0 : index
    %25 = vector.load %arg13[%24, %c0_21] : memref<4x16xf32, #tpu.memory_space<vmem>>, vector<2x16xf32>
    tpu.vector_store %arg13[%24, %c0_21], %21 {strides = array<i32>} : memref<4x16xf32, #tpu.memory_space<vmem>>, vector<2x16xf32>,
    %c1_i32 = arith.constant 1 : i32
    %26 = arith.cmpi eq, %arg0, %c1_i32 : i32
    %27 = arith.extui %26 : i1 to i32
    %c0_i32 = arith.constant 0 : i32
    %28 = arith.cmpi ne, %27, %c0_i32 : i32
    scf.if %28 {
      %c0_22 = arith.constant 0 : index
      %c0_23 = arith.constant 0 : index
      %29 = vector.load %arg13[%c0_22, %c0_23] : memref<4x16xf32, #tpu.memory_space<vmem>>, vector<4x16xf32>
      %c0_24 = arith.constant 0 : index
      %c0_25 = arith.constant 0 : index
      %30 = vector.load %arg5[%c0_24, %c0_25] : memref<16x64xf32, #tpu.memory_space<vmem>>, vector<16x64xf32>
      %cst_26 = arith.constant dense<0.000000e+00> : vector<4x64xf32>
      %31 = tpu.matmul %29, %30, %cst_26 {dimension_numbers = #tpu.dot_dimension_numbers<[1], [0], [0], [1], [0, 0, 1, 1], [], []>} : vector<4x16xf32>, vector<16x64xf32>, vector<4x64xf32> -> vector<4x64xf32>
      %c0_27 = arith.constant 0 : index
      %c0_28 = arith.constant 0 : index
      %32 = vector.load %arg6[%c0_27, %c0_28] : memref<1x64xf32, #tpu.memory_space<vmem>>, vector<1x64xf32>
      %33 = vector.broadcast %32 : vector<1x64xf32> to vector<4x64xf32>
      %34 = arith.addf %31, %33 : vector<4x64xf32>
      %cst_29 = arith.constant dense<0.000000e+00> : vector<64xf32>
      %35 = vector.multi_reduction <add>, %34, %cst_29 [0] : vector<4x64xf32> to vector<64xf32>
      %36 = vector.shape_cast %35 : vector<64xf32> to vector<1x64xf32>
      %cst_30 = arith.constant 4.000000e+00 : f32
      %37 = vector.broadcast %cst_30 : f32 to vector<1x64xf32>
      %38 = arith.divf %36, %37 : vector<1x64xf32>
      %39 = vector.broadcast %38 : vector<1x64xf32> to vector<4x64xf32>
      %40 = arith.subf %34, %39 : vector<4x64xf32>
      %41 = vector.broadcast %38 : vector<1x64xf32> to vector<4x64xf32>
      %42 = arith.subf %34, %41 : vector<4x64xf32>
      %43 = arith.mulf %40, %42 : vector<4x64xf32>
      %cst_31 = arith.constant dense<0.000000e+00> : vector<64xf32>
      %44 = vector.multi_reduction <add>, %43, %cst_31 [0] : vector<4x64xf32> to vector<64xf32>
      %45 = vector.shape_cast %44 : vector<64xf32> to vector<1x64xf32>
      %cst_32 = arith.constant 4.000000e+00 : f32
      %46 = vector.broadcast %cst_32 : f32 to vector<1x64xf32>
      %47 = arith.divf %45, %46 : vector<1x64xf32>
      %48 = vector.broadcast %38 : vector<1x64xf32> to vector<4x64xf32>
      %49 = arith.subf %34, %48 : vector<4x64xf32>
      %cst_33 = arith.constant 9.99999974E-6 : f32
      %50 = vector.broadcast %cst_33 : f32 to vector<1x64xf32>
      %51 = arith.addf %47, %50 : vector<1x64xf32>
      %52 = math.rsqrt %51 : vector<1x64xf32>
      %53 = vector.broadcast %52 : vector<1x64xf32> to vector<4x64xf32>
      %54 = arith.mulf %49, %53 : vector<4x64xf32>
      %c0_34 = arith.constant 0 : index
      %c0_35 = arith.constant 0 : index
      %55 = vector.load %arg7[%c0_34, %c0_35] : memref<1x64xf32, #tpu.memory_space<vmem>>, vector<1x64xf32>
      %56 = vector.broadcast %55 : vector<1x64xf32> to vector<4x64xf32>
      %57 = arith.mulf %54, %56 : vector<4x64xf32>
      %c0_36 = arith.constant 0 : index
      %c0_37 = arith.constant 0 : index
      %58 = vector.load %arg8[%c0_36, %c0_37] : memref<1x64xf32, #tpu.memory_space<vmem>>, vector<1x64xf32>
      %59 = vector.broadcast %58 : vector<1x64xf32> to vector<4x64xf32>
      %60 = arith.addf %57, %59 : vector<4x64xf32>
      %cst_38 = arith.constant 0.000000e+00 : f32
      %61 = vector.broadcast %cst_38 : f32 to vector<4x64xf32>
      %62 = arith.maximumf %60, %61 : vector<4x64xf32>
      %c0_39 = arith.constant 0 : index
      %c0_40 = arith.constant 0 : index
      %63 = vector.load %arg9[%c0_39, %c0_40] : memref<64x128xf32, #tpu.memory_space<vmem>>, vector<64x128xf32>
      %cst_41 = arith.constant dense<0.000000e+00> : vector<4x128xf32>
      %64 = tpu.matmul %62, %63, %cst_41 {dimension_numbers = #tpu.dot_dimension_numbers<[1], [0], [0], [1], [0, 0, 1, 1], [], []>} : vector<4x64xf32>, vector<64x128xf32>, vector<4x128xf32> -> vector<4x128xf32>
      %c0_42 = arith.constant 0 : index
      %c0_43 = arith.constant 0 : index
      %65 = vector.load %arg10[%c0_42, %c0_43] : memref<1x128xf32, #tpu.memory_space<vmem>>, vector<1x128xf32>
      %66 = vector.broadcast %65 : vector<1x128xf32> to vector<4x128xf32>
      %67 = arith.addf %64, %66 : vector<4x128xf32>
      %cst_44 = arith.constant dense<0xFF800000> : vector<4xf32>
      %68 = vector.multi_reduction <maximumf>, %67, %cst_44 [1] : vector<4x128xf32> to vector<4xf32>
      %69 = vector.shape_cast %68 : vector<4xf32> to vector<4x1xf32>
      %70 = vector.broadcast %69 : vector<4x1xf32> to vector<4x128xf32>
      %71 = arith.subf %67, %70 : vector<4x128xf32>
      %72 = math.exp %71 : vector<4x128xf32>
      %cst_45 = arith.constant dense<0.000000e+00> : vector<4xf32>
      %73 = vector.multi_reduction <add>, %72, %cst_45 [1] : vector<4x128xf32> to vector<4xf32>
      %74 = vector.shape_cast %73 : vector<4xf32> to vector<4x1xf32>
      %75 = vector.broadcast %74 : vector<4x1xf32> to vector<4x128xf32>
      %76 = arith.divf %72, %75 : vector<4x128xf32>
      %c0_46 = arith.constant 0 : index
      %c0_47 = arith.constant 0 : index
      %77 = vector.load %arg11[%c0_46, %c0_47] : memref<4x128xf32, #tpu.memory_space<vmem>>, vector<4x128xf32>
      tpu.vector_store %arg11[%c0_46, %c0_47], %76 {strides = array<i32>} : memref<4x128xf32, #tpu.memory_space<vmem>>, vector<4x128xf32>,
    } else {
    }
    return
  }
  func.func @transform_0(%arg0: i32) -> (i32, i32) {
    %c0_i32 = arith.constant 0 : i32
    %c0_i32_0 = arith.constant 0 : i32
    return %arg0, %c0_i32 : i32, i32
  }
  func.func @transform_1(%arg0: i32) -> (i32, i32) {
    %c0_i32 = arith.constant 0 : i32
    %c0_i32_0 = arith.constant 0 : i32
    return %arg0, %c0_i32 : i32, i32
  }
  func.func @transform_2(%arg0: i32) -> (i32, i32, i32) {
    %c0_i32 = arith.constant 0 : i32
    %c0_i32_0 = arith.constant 0 : i32
    %c0_i32_1 = arith.constant 0 : i32
    %c0_i32_2 = arith.constant 0 : i32
    return %c0_i32, %c0_i32_0, %c0_i32_1 : i32, i32, i32
  }
  func.func @transform_3(%arg0: i32) -> (i32, i32, i32) {
    %c0_i32 = arith.constant 0 : i32
    %c0_i32_0 = arith.constant 0 : i32
    %c0_i32_1 = arith.constant 0 : i32
    %c0_i32_2 = arith.constant 0 : i32
    return %c0_i32, %c0_i32_0, %c0_i32_1 : i32, i32, i32
  }
  func.func @transform_4(%arg0: i32) -> (i32, i32) {
    %c0_i32 = arith.constant 0 : i32
    %c0_i32_0 = arith.constant 0 : i32
    %c0_i32_1 = arith.constant 0 : i32
    return %c0_i32, %c0_i32_0 : i32, i32
  }
  func.func @transform_5(%arg0: i32) -> (i32, i32) {
    %c0_i32 = arith.constant 0 : i32
    %c0_i32_0 = arith.constant 0 : i32
    %c0_i32_1 = arith.constant 0 : i32
    return %c0_i32, %c0_i32_0 : i32, i32
  }
  func.func @transform_6(%arg0: i32) -> (i32, i32) {
    %c0_i32 = arith.constant 0 : i32
    %c0_i32_0 = arith.constant 0 : i32
    %c0_i32_1 = arith.constant 0 : i32
    return %c0_i32, %c0_i32_0 : i32, i32
  }
  func.func @transform_7(%arg0: i32) -> (i32, i32) {
    %c0_i32 = arith.constant 0 : i32
    %c0_i32_0 = arith.constant 0 : i32
    %c0_i32_1 = arith.constant 0 : i32
    return %c0_i32, %c0_i32_0 : i32, i32
  }
  func.func @transform_8(%arg0: i32) -> (i32, i32) {
    %c0_i32 = arith.constant 0 : i32
    %c0_i32_0 = arith.constant 0 : i32
    %c0_i32_1 = arith.constant 0 : i32
    return %c0_i32, %c0_i32_0 : i32, i32
  }
  func.func @transform_9(%arg0: i32) -> (i32, i32) {
    %c0_i32 = arith.constant 0 : i32
    %c0_i32_0 = arith.constant 0 : i32
    %c0_i32_1 = arith.constant 0 : i32
    return %c0_i32, %c0_i32_0 : i32, i32
  }
  func.func @transform_10(%arg0: i32) -> (i32, i32) {
    %c0_i32 = arith.constant 0 : i32
    %c0_i32_0 = arith.constant 0 : i32
    %c0_i32_1 = arith.constant 0 : i32
    return %c0_i32, %c0_i32_0 : i32, i32
  }
}

</mosaic_0001>

<bundles_post_ra>
// kernel: sage_test_forward.1
= control target key start
LH: loop header
LB: loop body
LE: loop exit
PB: predicated region body
PF: predicated region fallthrough
CT: control target
= control target key end

     0   :  { %15 = vsyncpa [#allocation5], 0  ;;  %s1282_s13 = smov 0   ;;  %s1411_s0 = inlined_call_operand.vmem [shape: f32[32,16], index: 0, kind: input, shape index: {}]   ;;  %s1412_s1 = inlined_call_operand.vmem [shape: f32[32,16], index: 1, kind: input, shape index: {}]   ;;  %s1413_s2 = inlined_call_operand.vmem [shape: f32[2,32,16], index: 2, kind: input, shape index: {}]   ;;  %s1414_s3 = inlined_call_operand.vmem [shape: f32[2,1,16], index: 3, kind: input, shape index: {}]   ;;  %s1415_s4 = inlined_call_operand.vmem [shape: f32[16,64], index: 4, kind: input, shape index: {}]   ;;  %s1416_s5 = inlined_call_operand.vmem [shape: f32[1,64], index: 5, kind: input, shape index: {}]   ;;  %s1417_s6 = inlined_call_operand.vmem [shape: f32[1,64], index: 6, kind: input, shape index: {}]   ;;  %s1418_s7 = inlined_call_operand.vmem [shape: f32[1,64], index: 7, kind: input, shape index: {}]   ;;  %s1419_s8 = inlined_call_operand.vmem [shape: f32[64,128], index: 8, kind: input, shape index: {}]   ;;  %s1420_s9 = inlined_call_operand.vmem [shape: f32[1,128], index: 9, kind: input, shape index: {}]   ;;  %s1421_s10 = inlined_call_operand.hbm [shape: f32[4,128], index: 10, kind: output, shape index: {}]  }
   0x1 LB: > { %s1288_s14 = sadd.s32 4294967295, %s1221_s13   ;;  %p1037_p0 = scmp.ge.s32.totalorder %s1221_s13, 1  ;;  %s1221_s13 = sphi %s1282_s13, %s21_s13  }
   0x2   : > { %p320_p1 = scmp.lt.s32.totalorder %s1221_s13, 3 }
   0x4   : > { %p321_p2 = pnand %p1037_p0, %p320_p1 }
   0x5   : > { %s1293_s15 = sshll.u32 (!%p321_p2), %s1288_s14, 1  ;;  %s1223_s24 = smov (!%p321_p2), 16  }
   0x6   : > { %324 = sbr.rel (%p321_p2) target bundleno = 1602 (0x642), region = 60  ;;  %p359_p3 = scmp.lt.s32.totalorder (!%p321_p2), %s1293_s15, 3 }
   0x7   : > { %s742_s28 = scalar_lea.vmem (!%p321_p2), [#allocation3], %s1293_s15  ;;  %p1058_p4 = scmp.ne.s32.totalorder (!%p321_p2), %s1288_s14, 1 }
   0xb   : > { %s360_s16 = scalar_select %p359_p3, %s1293_s15, 3  ;;  %vm374_vm0 = vcmask 130048   ;;  %v469_v4 = vld [vmem:[%s1413_s2 + $0x18] sm:$0xff]  ;;  %v468_v5 = vld [vmem:[%s1413_s2 + $0x10] sm:$0xff]  ;;  %v467_v6 = vld [vmem:[%s1413_s2 + $0x8] sm:$0xff]  ;;  %vm477_vm1 = vcmask 261120  }
   0xc   : > { %v466_v7 = vld [vmem:[%s1413_s2] sm:$0xff]  ;;  %v1052_v19 = vld [vmem:[%s1413_s2 + $0x38] sm:$0xff]  ;;  %v1051_v20 = vld [vmem:[%s1413_s2 + $0x30] sm:$0xff]  ;;  %vm743_vm2 = vcmask 123904  }
   0xd   : > { %s1039_s17 = sshll.u32 %s360_s16, 3  ;;  %v1044_v14 = vld [vmem:[%s1414_s3] ss:$0 sm:$0xff]  ;;  %v1050_v21 = vld [vmem:[%s1413_s2 + $0x28] sm:$0xff]  ;;  %v1054_v29 = vld [vmem:[%s1414_s3 + $0x1] ss:$0 sm:$0xff] }
   0xe   : > { %s362_s20 = scalar_lea.vmem %s1411_s0, %s1039_s17  ;;  %s368_s23 = scalar_lea.vmem %s1412_s1, %s1039_s17  ;;  %v1049_v22 = vld [vmem:[%s1413_s2 + $0x20] sm:$0xff] }
   0xf   : > { %v371_v0 = vld [vmem:[%s362_s20 + $0x8] sm:$0xff]  ;;  %v370_v1 = vld [vmem:[%s362_s20] sm:$0xff] }
  0x10   : > { %v372_v2 = vld [vmem:[%s368_s23] sm:$0xff]  ;;  %1101 = vmatprep.subr.mxu1 %v371_v0  ;;  %v373_v3 = vld [vmem:[%s368_s23 + $0x8] sm:$0xff]  ;;  %458 = vrot.lane.b32.xlu0 %v370_v1, %s1223_s24 }
  0x11   : > { %1105 = vmatprep.mubr.msk.f32.mxu1 %vm374_vm0, %v372_v2  ;;  %1102 = vmatpush3.msra.mxu1 %v371_v0 }
  0x12   : > { %1103 = vmatprep.subr.mxu1 %v370_v1  ;;  %1123 = vmatprep.mubr.msk.f32.mxu0 %vm374_vm0, %v372_v2 }
  0x13   : > { %1104 = vmatpush3.msra.mxu1 %v370_v1 }
  0x14   : > { %1106 = vmatmul.mubr.msk.f32.vlgmr.msra.gmra.mxu1 %vm374_vm0, %v373_v3  ;;  %1108 = vmatprep.subr.mxu1 %v469_v4 }
  0x15   : > { %460 = vrot.lane.b32.xlu0 %v371_v0, %s1223_s24  ;;  %1109 = vmatpush3.msra.mxu1 %v469_v4 }
  0x16   : > { %1110 = vmatprep.subr.mxu1 %v468_v5 }
  0x17   : > { %1111 = vmatpush3.msra.mxu1 %v468_v5 }
  0x18   : > { %1112 = vmatprep.subr.mxu1 %v467_v6 }
  0x19   : > { %1113 = vmatpush3.msra.mxu1 %v467_v6 }
  0x1a   : > { %1114 = vmatprep.subr.mxu1 %v466_v7 }
  0x1b   : > { %1115 = vmatpush3.msra.mxu1 %v466_v7 }
  0x82   : > { %v459_v8 = vpop.permute.xlu0 %458 }
  0x87   : > { %v461_v10 = vpop.permute.xlu0 %460 }
  0xd4   : > { %v1107_v9 = vpop.f32.mrf.mxu1 }
  0xd5   : > { %v465_v13 = vsel %vm374_vm0, %v1107_v9, %v461_v10 }
  0xd6   : > { %v447_v11 = vpop.f32.mrf.mxu1 }
  0xd7   : > { %v464_v12 = vsel %vm374_vm0, %v447_v11, %v459_v8 }
  0xd8   : > { %1116 = vmatprep.mubr.msk.f32.mxu1 %vm477_vm1, %v464_v12 }
  0xd9   : > { %1117 = vmatmul.mubr.msk.f32.vlgmr.msra.gmra.mxu1 %vm477_vm1, %v465_v13 }
 0x199   : > { %v1118_v15 = vpop.f32.mrf.mxu1 }
 0x19a   : > { %v556_v16 = vadd.f32 %v1118_v15, %v1044_v14 }
 0x19b   : > { %v550_v17 = vpop.f32.mrf.mxu1 }
 0x19c   : > { %v551_v18 = vadd.f32 %v1044_v14, %v550_v17  ;;  %1119 = vmatprep.subr.mxu0 %v556_v16 }
 0x19d   : > { %1120 = vmatpush3.msra.mxu0 %v556_v16 }
 0x19e   : > { %636 = vrot.lane.b32.xlu1 %v551_v18, %s1223_s24  ;;  %1121 = vmatprep.subr.mxu0 %v551_v18 }
 0x19f   : > { %1122 = vmatpush3.msra.mxu0 %v551_v18 }
 0x1a0   : > { %1124 = vmatmul.mubr.msk.f32.vlgmr.msra.gmra.mxu0 %vm374_vm0, %v373_v3  ;;  %1126 = vmatprep.subr.mxu0 %v1052_v19 }
 0x1a1   : > { %1127 = vmatpush3.msra.mxu0 %v1052_v19 }
 0x1a2   : > { %638 = vrot.lane.b32.xlu1 %v556_v16, %s1223_s24  ;;  %1128 = vmatprep.subr.mxu0 %v1051_v20 }
 0x1a3   : > { %1129 = vmatpush3.msra.mxu0 %v1051_v20 }
 0x1a4   : > { %1130 = vmatprep.subr.mxu0 %v1050_v21 }
 0x1a5   : > { %1131 = vmatpush3.msra.mxu0 %v1050_v21 }
 0x1a6   : > { %1132 = vmatprep.subr.mxu0 %v1049_v22 }
 0x1a7   : > { %1133 = vmatpush3.msra.mxu0 %v1049_v22 }
 0x210   : > { %v637_v23 = vpop.permute.xlu1 %636 }
 0x214   : > { %v639_v26 = vpop.permute.xlu1 %638 }
 0x260   : > { %v1125_v24 = vpop.f32.mrf.mxu0 }
 0x261   : > { %v643_v28 = vsel %vm374_vm0, %v1125_v24, %v639_v26 }
 0x262   : > { %v625_v25 = vpop.f32.mrf.mxu0 }
 0x263   : > { %v642_v27 = vsel %vm374_vm0, %v625_v25, %v637_v23 }
 0x264   : > { %1134 = vmatprep.mubr.msk.f32.mxu0 %vm477_vm1, %v642_v27 }
 0x265   : > { %1135 = vmatmul.mubr.msk.f32.vlgmr.msra.gmra.mxu0 %vm477_vm1, %v643_v28 }
 0x325   : > { %v1136_v30 = vpop.f32.mrf.mxu0 }
 0x326   : > { %v735_v31 = vadd.f32 %v1136_v30, %v1054_v29 }
 0x327   : > { %v729_v32 = vpop.f32.mrf.mxu0 }
 0x328   : > { %739 = vst.msk [vmem:[#allocation2 + $0x8] sm:$0xff] %vm374_vm0, %v735_v31  ;;  %v730_v33 = vadd.f32 %v1054_v29, %v729_v32 }
 0x32a   : > { %738 = vst.msk [vmem:[#allocation2] sm:$0xff] %vm374_vm0, %v730_v33 }
 0x32e   : > { %748 = sbr.rel (%p1058_p4) target bundleno = 1587 (0x633), region = 64 }
 0x331   : > { %v740_v34 = vld [vmem:[#allocation2] ss:$8 sm:$0x3] }
 0x332   : > { %744 = vst.msk [vmem:[%s742_s28] sm:$0x3] %vm743_vm2, %v740_v34 }
 0x333   : > { %v751_v35 = vld [vmem:[%s1415_s4 + $0x8] sm:$0xff]  ;;  %v1224_v36 = vmov 0.0   ;;  %v750_v37 = vld [vmem:[%s1415_s4] sm:$0xff]  ;;  %vm1225_vm3 = vmmov 0   ;;  %v879_v39 = vld [vmem:[%s1419_s8 + $0x38] sm:$0xff]  ;;  %vm832_vm4 = vcmask 519168  }
 0x334   : > { %1137 = vmatprep.subr.mxu0 %v1224_v36  ;;  %1141 = vmatprep.mubr.msk.f32.mxu0 %vm1225_vm3, %v1224_v36  ;;  %v878_v40 = vld [vmem:[%s1419_s8 + $0x30] sm:$0xff]  ;;  %v877_v41 = vld [vmem:[%s1419_s8 + $0x28] sm:$0xff]  ;;  %v876_v42 = vld [vmem:[%s1419_s8 + $0x20] sm:$0xff]  ;;  %vm887_vm5 = vcmask 523264   ;;  %vm961_vm6 = vcmask 1043456  }
 0x335   : > { %1138 = vmatpush3.msra.mxu0 %v751_v35  ;;  %1144 = vmatprep.subr.mxu1 %v1224_v36  ;;  %v875_v43 = vld [vmem:[%s1419_s8 + $0x18] sm:$0xff]  ;;  %v874_v44 = vld [vmem:[%s1419_s8 + $0x10] sm:$0xff]  ;;  %v873_v45 = vld [vmem:[%s1419_s8 + $0x8] sm:$0xff] }
 0x336   : > { %1139 = vmatprep.subr.mxu0 %v1224_v36  ;;  %1160 = vmatprep.mubr.msk.f32.mxu1 %vm1225_vm3, %v1224_v36  ;;  %v872_v46 = vld [vmem:[%s1419_s8] sm:$0xff] }
 0x337   : > { %1140 = vmatpush3.msra.mxu0 %v750_v37  ;;  %1145 = vmatpush3.msra.mxu1 %v879_v39  ;;  %v1059_v47 = vld [vmem:[%s1416_s5] ss:$0 sm:$0xff] }
 0x338   : > { %1146 = vmatprep.subr.mxu1 %v1224_v36  ;;  %v1061_v7 = vld [vmem:[%s1417_s6] ss:$0 sm:$0xff] }
 0x339   : > { %v749_v38 = vld [vmem:[#allocation3] sm:$0xf]  ;;  %1147 = vmatpush3.msra.mxu1 %v878_v40  ;;  %v1062_v9 = vld [vmem:[%s1418_s7] ss:$0 sm:$0xff] }
 0x33a   : > { %1142 = vmatmul.mubr.msk.f32.vlgmr.msra.gmra.mxu0 %vm374_vm0, %v749_v38  ;;  %1148 = vmatprep.subr.mxu1 %v1224_v36  ;;  %v1063_v13 = vld [vmem:[%s1420_s9] ss:$0 sm:$0xff] }
 0x33b   : > { %1149 = vmatpush3.msra.mxu1 %v877_v41 }
 0x33c   : > { %1150 = vmatprep.subr.mxu1 %v1224_v36 }
 0x33d   : > { %1151 = vmatpush3.msra.mxu1 %v876_v42 }
 0x33e   : > { %1152 = vmatprep.subr.mxu1 %v1224_v36 }
 0x33f   : > { %1153 = vmatpush3.msra.mxu1 %v875_v43 }
 0x340   : > { %1154 = vmatprep.subr.mxu1 %v1224_v36 }
 0x341   : > { %1155 = vmatpush3.msra.mxu1 %v874_v44 }
 0x342   : > { %1156 = vmatprep.subr.mxu1 %v1224_v36 }
 0x343   : > { %1157 = vmatpush3.msra.mxu1 %v873_v45 }
 0x344   : > { %1158 = vmatprep.subr.mxu1 %v1224_v36 }
 0x345   : > { %1159 = vmatpush3.msra.mxu1 %v872_v46 }
 0x3fa   : > { %v828_v48 = vpop.f32.mrf.mxu0 }
 0x3fb   : > { %v829_v49 = vadd.f32 %v1059_v47, %v828_v48 }
 0x3fc   : > { %v1143_v50 = vpop.f32.mrf.mxu0 }
 0x3fd   : > { %v833_v51 = vsel %vm832_vm4, %v829_v49, 0.0 }
 0x3fe   : > { %v834_v52 = vrot.slane %v833_v51, 4 }
 0x400   : > { %v835_v53 = vadd.f32 %v834_v52, %v833_v51 }
 0x402   : > { %v836_v54 = vrot.slane %v835_v53, 2 }
 0x404   : > { %v837_v55 = vadd.f32 %v836_v54, %v835_v53 }
 0x406   : > { %v838_v56 = vrot.slane %v837_v55, 1 }
 0x408   : > { %v839_v57 = vadd.f32 %v838_v56, %v837_v55 }
 0x40a   : > { %v841_v58 = vmul.f32 0.25, %v839_v57 }
 0x40c   : > { %v842_v59 = vsub.f32 %v829_v49, %v841_v58 }
 0x40e   : > { %v843_v60 = vmul.f32 %v842_v59, %v842_v59 }
 0x410   : > { %v844_v61 = vsel %vm832_vm4, %v843_v60, 0.0 }
 0x411   : > { %v845_v62 = vrot.slane %v844_v61, 4 }
 0x413   : > { %v846_v63 = vadd.f32 %v845_v62, %v844_v61 }
 0x415   : > { %v847_v0 = vrot.slane %v846_v63, 2 }
 0x417   : > { %v848_v1 = vadd.f32 %v847_v0, %v846_v63 }
 0x419   : > { %v849_v2 = vrot.slane %v848_v1, 1 }
 0x41b   : > { %v850_v3 = vadd.f32 %v849_v2, %v848_v1 }
 0x41d   : > { %v851_v4 = vmul.f32 0.25, %v850_v3 }
 0x41f   : > { %v852_v5 = vadd.f32 1e-05, %v851_v4 }
 0x421   : > { %1181 = vrsqrt.f32 %v852_v5 }
 0x42e   : > { %v1182_v6 = vpop.eup %1181 }
 0x42f   : > { %v854_v8 = vmul.f32 %v1182_v6, %v842_v59 }
 0x431   : > { %v862_v10 = vmul.f32 %v1061_v7, %v854_v8 }
 0x433   : > { %v870_v11 = vadd.f32 %v1062_v9, %v862_v10 }
 0x435   : > { %v871_v12 = vmax.f32 %v870_v11, 0.0 }
 0x437   : > { %1161 = vmatmul.mubr.msk.f32.vlgmr.msra.gmra.mxu1 %vm887_vm5, %v871_v12 }
 0x4f7   : > { %v957_v14 = vpop.f32.mrf.mxu1 }
 0x4f8   : > { %v958_v15 = vadd.f32 %v1063_v13, %v957_v14 }
 0x4f9   : > { %v1162_v16 = vpop.f32.mrf.mxu1 }
 0x4fa   : > { %v962_v17 = vsel %vm961_vm6, %v958_v15, -inf }
 0x4fb   : > { %963 = vmax.xlane.f32.xlu0 %v962_v17 }
 0x584   : > { %v964_v18 = vpop.xlane.xlu0 %963 }
 0x585   : > { %v965_v19 = vsub.f32 %v958_v15, %v964_v18 }
 0x587   : > { %v966_v20 = vmul.f32 1.442695, %v965_v19 }
 0x589   : > { %1183 = vpow2.f32 %v966_v20 }
 0x596   : > { %v1184_v21 = vpop.eup %1183 }
 0x597   : > { %v968_v22 = vsel %vm961_vm6, %v1184_v21, 0.0 }
 0x598   : > { %969 = vadd.xlane.f32.xlu0 %v968_v22 }
 0x621   : > { %v970_v23 = vpop.xlane.xlu0 %969 }
 0x622   : > { %1185 = vrcp.f32 %v970_v23 }
 0x62f   : > { %v1186_v24 = vpop.eup %1185 }
 0x630   : > { %v972_v25 = vmul.f32 %v1186_v24, %v1184_v21 }
 0x632   : > { %973 = vst [vmem:[#allocation4] sm:$0xf] %v972_v25 }
 0x633 PF: > { %p1167_p5 = scmp.eq.s32.totalorder %s1288_s14, 1  ;;  %s1226_s21 = smov [#allocation4]  }
 0x634   : > { %s981_s22 = sshll.u32 %s1226_s21, 4  ;;  %s982_s22 = int_to_ptr.vmem [resolvable:$true] %s981_s22 }
 0x635   : > { %s1187_s23 = scalar_lea.vmem %s982_s22, 64  ;;  %p1194_p9 = scmp.lt.s32.totalorder %s982_s22, %s982_s22 }
 0x636   : > { %p1188_p6 = scmp.ne.s32.totalorder %s982_s22, %s1187_s23  ;;  %p1195_p10 = scmp.lt.s32.totalorder %s1187_s23, %s1187_s23 }
 0x638   : > { %p1189_p7 = pnand %p1188_p6, %p1167_p5  ;;  %p1196_p11 = por %p1195_p10, %p1194_p9 }
 0x63a   : > { %p1190_p8 = pneg %p1189_p7 }
 0x63c   : > { %p1197_p12 = pnand %p1196_p11, %p1190_p8 }
 0x63e   : > { %1200 = shalt.err (!%p1197_p12)
}
 0x63f   : > { %1164 = dma.vmem_to_hbm [thread:$0]  (%p1167_p5), %s982_s22, 64, %s1421_s10, [#allocation5]  }
 0x640   : > { %1216 = dma.done.wait (%p1167_p5), [#allocation5], 64  }
 0x641   : > { %1218 = vsyncadd (%p1167_p5), [#allocation5], 4294967232 }
 0x642 PF: > { %s21_s13 = sadd.s32 1, %s1221_s13  }
 0x643   : > { %p18_p13 = scmp.ge.s32.totalorder %s21_s13, 4  }
 0x645   :  { %20 = sbr.rel (!%p18_p13) target bundleno = 1 (0x1), region = 97 }
 0x64a   :  { %994 = vsyncpa [#allocation5], 1 }
 0x64b   :  { %996 = vsyncpa [#allocation5 + $0x1], 1 }

</bundles_post_ra>
